<compile_context>
chip_gen: v6e
topology: v6e:2x2x1
jax: 0.10.0
libtpu: 0.0.40
codegen_flags: <defaults>
</compile_context>

<pallas_src>
import jax
import jax.numpy as jnp
from jax.experimental import pallas as pl
from jax.experimental.pallas import tpu as pltpu


def _eca_kernel(w_ref, x_ref, o_ref, ybuf):
    """Fused pool -> k-tap channel conv -> sigmoid -> rescale, one batch elem.

    w_ref : (k,)           f32 SMEM   Conv1d taps, pre-divided by H*W
    x_ref : (1, HW, C)     VMEM       one batch element, channels on lanes
    o_ref : (1, HW, C)     VMEM
    ybuf  : (1, C + 2*pad) f32 VMEM   zero-haloed pooled row (conv halo)
    """
    HW = x_ref.shape[1]
    C = x_ref.shape[2]
    k = w_ref.shape[0]
    pad = (k - 1) // 2

    xblk = x_ref[0]                                     # (HW, C), packed dtype

    # Global average pool as an MXU dot against a ones row: lane-major (1, C)
    # result with f32 accumulation.  (1/(H*W) is folded into the taps.)
    ones_row = jnp.ones((1, HW), dtype=xblk.dtype)
    y = jnp.dot(ones_row, xblk, preferred_element_type=jnp.float32)   # (1, C)

    # Conv1d(1, 1, k, zero padding) over the channel axis == k shifted
    # lane-windows of the zero-haloed pooled row:
    #   conv[c] = sum_j w[j] * y[c + j - pad]
    if pad > 0:
        ybuf[:, 0:pad] = jnp.zeros((1, pad), jnp.float32)
        ybuf[:, pad + C:pad + C + pad] = jnp.zeros((1, pad), jnp.float32)
    ybuf[:, pad:pad + C] = y
    conv = w_ref[0] * ybuf[:, 0:C]
    for j in range(1, k):
        conv = conv + w_ref[j] * ybuf[:, j:j + C]

    gate = jax.nn.sigmoid(conv)                         # (1, C) f32

    # Channel-wise rescale: the gate lane-broadcasts over the HW sublanes and
    # x stays in its packed dtype (gate rounds to x dtype before the multiply).
    # Store is lane-dense whenever C is a multiple of 128 (all ECA backbones).
    o_ref[0] = xblk * gate.astype(o_ref.dtype)


def eca_forward_channels_last(x, conv_weight, *, donate_input=False):
    """ECA forward on channels-last input.  x: (B, H, W, C); conv_weight: (k,)."""
    B, H, W, C = x.shape
    HW = H * W
    k = int(conv_weight.shape[0])
    pad = (k - 1) // 2

    # Fold the average-pool divisor into the taps so the kernel only sums.
    w = conv_weight.astype(jnp.float32).reshape(k) / jnp.float32(HW)

    x3 = x.reshape(B, HW, C)                 # free reshape; C stays minor/lane
    itemsize = int(x3.dtype.itemsize)
    block_bytes = HW * C * itemsize

    # Double-buffered input + output blocks plus headroom, clamped so we never
    # request more than v7x's 64 MiB physical VMEM (default scoped limits are
    # 16/32/32 MiB on v5e/v6e/v7x).
    vmem_limit = int(min(max(4 * block_bytes + (2 << 20), 32 << 20), 64 << 20))
    # TODO(synk): for B == 1 inference (v7x dual-TC idle) or slabs where
    # 4*block_bytes pushes past the v7x scoped-VMEM budget, add a channel-tile
    # grid axis (grid=(B, cdiv(C, CT)) with a +-pad lane halo on the input
    # block) for pipeline depth; at typical ECA layer sizes (<= a few MB per
    # slab) the whole-slab form already pipelines across B with the minimal
    # 2x HBM traffic.

    cost = pl.CostEstimate(
        flops=3 * B * HW * C,                # pool adds + rescale muls (conv is O(B*C*k))
        transcendentals=B * C,               # sigmoid
        bytes_accessed=2 * B * HW * C * itemsize,
    )

    out = pl.pallas_call(
        _eca_kernel,
        out_shape=jax.ShapeDtypeStruct((B, HW, C), x3.dtype),
        grid_spec=pltpu.PrefetchScalarGridSpec(
            num_scalar_prefetch=0,
            grid=(B,),
            in_specs=[
                # k conv taps live in SMEM (scalar reads); untiled, loaded once.
                pl.BlockSpec(memory_space=pltpu.MemorySpace.SMEM),
                pl.BlockSpec((1, HW, C), lambda b: (b, 0, 0)),
            ],
            out_specs=pl.BlockSpec((1, HW, C), lambda b: (b, 0, 0)),
            scratch_shapes=[pltpu.VMEM((1, C + 2 * pad), jnp.float32)],
        ),
        compiler_params=pltpu.CompilerParams(
            dimension_semantics=("parallel",),
            vmem_limit_bytes=vmem_limit,
        ),
        cost_estimate=cost,
        # Pure per-element rescale of x: callers that do not need x afterwards
        # can alias it to the output and save a B*HW*C HBM allocation.
        input_output_aliases=({1: 0} if donate_input else {}),
    )(w, x3)

    return out.reshape(B, H, W, C)


def eca_forward(x, conv_weight, *, donate_input=False):
    """Drop-in NCHW entry matching the PyTorch module.  x: (B, C, H, W).

    The NCHW<->NHWC transposes here are wrapper-level layout plumbing; in a
    real TPU model the surrounding network should be NHWC so they disappear.
    """
    x_cl = jnp.transpose(x, (0, 2, 3, 1))                    # (B, H, W, C)
    out_cl = eca_forward_channels_last(x_cl, conv_weight, donate_input=donate_input)
    return jnp.transpose(out_cl, (0, 3, 1, 2))               # back to (B, C, H, W)


def eca_reference(x, conv_weight):
    """Plain-JAX reference matching the PyTorch module (NCHW)."""
    B, C, H, W = x.shape
    k = conv_weight.shape[0]
    pad = (k - 1) // 2
    y = jnp.mean(x, axis=(2, 3))                             # (B, C)
    y_pad = jnp.pad(y, ((0, 0), (pad, pad)))                 # zero padding
    conv = jnp.zeros_like(y)
    for j in range(k):
        conv = conv + conv_weight[j] * y_pad[:, j:j + C]
    s = jax.nn.sigmoid(conv)                                 # (B, C)
    return x * s[:, :, None, None]


if __name__ == "__main__":
    key = jax.random.PRNGKey(0)
    kx, kw = jax.random.split(key)

    B, C, H, W = 2, 4, 16, 16
    k_size = 3

    x = jax.random.normal(kx, (B, C, H, W), dtype=jnp.float32)
    conv_weight = jax.random.uniform(
        kw, (k_size,), dtype=jnp.float32, minval=-0.5, maxval=0.5)

    out = jax.block_until_ready(eca_forward(x, conv_weight))
    ref = eca_reference(x, conv_weight)
    assert out.shape == (B, C, H, W)
    assert jnp.allclose(out, ref, atol=1e-5, rtol=1e-5), "mismatch vs reference"

    # Second check: B=1 plus non-multiple-of-8/128 C and HW (7x7 feature map),
    # exercising the masked/unaligned lowering paths flagged in review.
    x2 = jax.random.normal(jax.random.PRNGKey(1), (1, 6, 7, 7), dtype=jnp.float32)
    out2 = jax.block_until_ready(eca_forward(x2, conv_weight))
    ref2 = eca_reference(x2, conv_weight)
    assert jnp.allclose(out2, ref2, atol=1e-5, rtol=1e-5), "mismatch vs reference (7x7)"

    print("KERNEL_OK")
</pallas_src>

<mosaic_0001>
module attributes {stable_mosaic.version = 11 : i64} {
  func.func @_eca_kernel(%arg0: i32, %arg1: memref<3xf32, #tpu.memory_space<smem>>, %arg2: memref<1x256x4xf32, #tpu.memory_space<vmem>>, %arg3: memref<1x256x4xf32, #tpu.memory_space<vmem>>, %arg4: memref<1x6xf32, #tpu.memory_space<vmem>>) attributes {dimension_semantics = [#tpu.dimension_semantics<parallel>], iteration_bounds = array<i64: 2>, scalar_prefetch = 0 : i64, scratch_operands = 1 : i64, tpu.core_type = #tpu.core_type<tc>, window_params = [{transform_indices = @transform_0, window_bounds = array<i64: 3>}, {transform_indices = @transform_1, window_bounds = array<i64: 1, 256, 4>}, {transform_indices = @transform_2, window_bounds = array<i64: 1, 256, 4>}]} {
    %c0 = arith.constant 0 : index
    %c0_0 = arith.constant 0 : index
    %c0_1 = arith.constant 0 : index
    %0 = vector.load %arg2[%c0, %c0_0, %c0_1] : memref<1x256x4xf32, #tpu.memory_space<vmem>>, vector<1x256x4xf32>
    %1 = vector.shape_cast %0 : vector<1x256x4xf32> to vector<256x4xf32>
    %cst = arith.constant 1.000000e+00 : f32
    %2 = vector.broadcast %cst : f32 to vector<1x256xf32>
    %cst_2 = arith.constant dense<0.000000e+00> : vector<1x4xf32>
    %3 = tpu.matmul %2, %1, %cst_2 {dimension_numbers = #tpu.dot_dimension_numbers<[1], [0], [0], [1], [0, 0, 1, 1], [], []>} : vector<1x256xf32>, vector<256x4xf32>, vector<1x4xf32> -> vector<1x4xf32>
    %cst_3 = arith.constant 0.000000e+00 : f32
    %4 = vector.broadcast %cst_3 : f32 to vector<1x1xf32>
    %c0_4 = arith.constant 0 : index
    %c0_5 = arith.constant 0 : index
    %5 = vector.load %arg4[%c0_4, %c0_5] : memref<1x6xf32, #tpu.memory_space<vmem>>, vector<1x1xf32>
    tpu.vector_store %arg4[%c0_4, %c0_5], %4 {strides = array<i32>} : memref<1x6xf32, #tpu.memory_space<vmem>>, vector<1x1xf32>,
    %cst_6 = arith.constant 0.000000e+00 : f32
    %6 = vector.broadcast %cst_6 : f32 to vector<1x1xf32>
    %c0_7 = arith.constant 0 : index
    %c5 = arith.constant 5 : index
    %7 = vector.load %arg4[%c0_7, %c5] : memref<1x6xf32, #tpu.memory_space<vmem>>, vector<1x1xf32>
    tpu.vector_store %arg4[%c0_7, %c5], %6 {strides = array<i32>} : memref<1x6xf32, #tpu.memory_space<vmem>>, vector<1x1xf32>,
    %c0_8 = arith.constant 0 : index
    %c1 = arith.constant 1 : index
    %8 = vector.load %arg4[%c0_8, %c1] : memref<1x6xf32, #tpu.memory_space<vmem>>, vector<1x4xf32>
    tpu.vector_store %arg4[%c0_8, %c1], %3 {strides = array<i32>} : memref<1x6xf32, #tpu.memory_space<vmem>>, vector<1x4xf32>,
    %c0_9 = arith.constant 0 : index
    %9 = memref.load %arg1[%c0_9] : memref<3xf32, #tpu.memory_space<smem>>
    %c0_10 = arith.constant 0 : index
    %c0_11 = arith.constant 0 : index
    %10 = vector.load %arg4[%c0_10, %c0_11] : memref<1x6xf32, #tpu.memory_space<vmem>>, vector<1x4xf32>
    %11 = vector.broadcast %9 : f32 to vector<1x4xf32>
    %12 = arith.mulf %11, %10 : vector<1x4xf32>
    %c1_12 = arith.constant 1 : index
    %13 = memref.load %arg1[%c1_12] : memref<3xf32, #tpu.memory_space<smem>>
    %c0_13 = arith.constant 0 : index
    %c1_14 = arith.constant 1 : index
    %14 = vector.load %arg4[%c0_13, %c1_14] : memref<1x6xf32, #tpu.memory_space<vmem>>, vector<1x4xf32>
    %15 = vector.broadcast %13 : f32 to vector<1x4xf32>
    %16 = arith.mulf %15, %14 : vector<1x4xf32>
    %17 = arith.addf %12, %16 : vector<1x4xf32>
    %c2 = arith.constant 2 : index
    %18 = memref.load %arg1[%c2] : memref<3xf32, #tpu.memory_space<smem>>
    %c0_15 = arith.constant 0 : index
    %c2_16 = arith.constant 2 : index
    %19 = vector.load %arg4[%c0_15, %c2_16] : memref<1x6xf32, #tpu.memory_space<vmem>>, vector<1x4xf32>
    %20 = vector.broadcast %18 : f32 to vector<1x4xf32>
    %21 = arith.mulf %20, %19 : vector<1x4xf32>
    %22 = arith.addf %17, %21 : vector<1x4xf32>
    %23 = arith.negf %22 : vector<1x4xf32>
    %24 = math.exp %23 : vector<1x4xf32>
    %cst_17 = arith.constant 1.000000e+00 : f32
    %25 = vector.broadcast %cst_17 : f32 to vector<1x4xf32>
    %26 = arith.addf %25, %24 : vector<1x4xf32>
    %27 = arith.divf %25, %26 : vector<1x4xf32>
    %28 = vector.broadcast %27 : vector<1x4xf32> to vector<256x4xf32>
    %29 = arith.mulf %1, %28 : vector<256x4xf32>
    %c0_18 = arith.constant 0 : index
    %c0_19 = arith.constant 0 : index
    %c0_20 = arith.constant 0 : index
    %30 = vector.load %arg3[%c0_18, %c0_19, %c0_20] : memref<1x256x4xf32, #tpu.memory_space<vmem>>, vector<1x256x4xf32>
    %31 = vector.shape_cast %30 : vector<1x256x4xf32> to vector<256x4xf32>
    %32 = vector.shape_cast %29 : vector<256x4xf32> to vector<1x256x4xf32>
    tpu.vector_store %arg3[%c0_18, %c0_19, %c0_20], %32 {strides = array<i32>} : memref<1x256x4xf32, #tpu.memory_space<vmem>>, vector<1x256x4xf32>,
    return
  }
  func.func @transform_0(%arg0: i32) -> i32 {
    %c0_i32 = arith.constant 0 : i32
    %c0_i32_0 = arith.constant 0 : i32
    return %c0_i32 : i32
  }
  func.func @transform_1(%arg0: i32) -> (i32, i32, i32) {
    %c0_i32 = arith.constant 0 : i32
    %c0_i32_0 = arith.constant 0 : i32
    %c0_i32_1 = arith.constant 0 : i32
    return %arg0, %c0_i32, %c0_i32_0 : i32, i32, i32
  }
  func.func @transform_2(%arg0: i32) -> (i32, i32, i32) {
    %c0_i32 = arith.constant 0 : i32
    %c0_i32_0 = arith.constant 0 : i32
    %c0_i32_1 = arith.constant 0 : i32
    return %arg0, %c0_i32, %c0_i32_0 : i32, i32, i32
  }
}

</mosaic_0001>

<bundles_post_ra>
// kernel: tpu_custom_call.1
= control target key start
LH: loop header
LB: loop body
LE: loop exit
PB: predicated region body
PF: predicated region fallthrough
CT: control target
= control target key end

     0   :  { %7 = vsyncpa [#allocation4], 0  ;;  %s563_s9 = smov 0   ;;  %s819_s0 = inlined_call_operand.vmem [shape: f32[3], index: 0, kind: input, shape index: {}]   ;;  %s820_s1 = inlined_call_operand.vmem [shape: f32[2,256,4], index: 1, kind: input, shape index: {}]   ;;  %s821_s2 = inlined_call_operand.vmem [shape: f32[2,256,4], index: 2, kind: output, shape index: {}]  }
   0x1 LB: > { %s434_s10 = sadd.s32 4294967295, %s540_s9   ;;  %p436_p0 = scmp.ge.s32.totalorder %s540_s9, 1  ;;  %s540_s9 = sphi %s563_s9, %s13_s9  }
   0x2   : > { %p91_p1 = scmp.lt.s32.totalorder %s540_s9, 3  ;;  %s104_s13 = sshll.u32 %s819_s0, 4  ;;  %s105_s13 = int_to_ptr.vmem [resolvable:$true] %s104_s13 }
   0x3   : > { %p495_p3 = scmp.eq.s32.totalorder %s434_s10, 0  ;;  %s515_s15 = scalar_lea.vmem %s105_s13, 16 }
   0x4   : > { %p574_p2 = pnand %p436_p0, %p91_p1  ;;  %p516_p6 = scmp.ne.s32.totalorder %s105_s13, %s515_s15 }
   0x5   : > { %p523_p10 = scmp.lt.s32.totalorder %s105_s13, %s105_s13  ;;  %p524_p11 = scmp.lt.s32.totalorder %s515_s15, %s515_s15 }
   0x6   : > { %p491_p4 = pneg %p574_p2 }
   0x7   : > { %p525_p12 = por %p524_p11, %p523_p10 }
   0x8   : > { %p492_p5 = pnand %p495_p3, %p491_p4 }
   0xa   : > { %p517_p7 = pneg %p492_p5 }
   0xc   : > { %p518_p8 = pnand %p517_p7, %p516_p6 }
   0xe   : > { %p519_p9 = pneg %p518_p8 }
  0x10   : > { %p526_p13 = pnand %p525_p12, %p519_p9 }
  0x12   : > { %529 = shalt.err (!%p526_p13)
}
  0x13   : > { %s542_s16 = smov [#allocation3]   ;;  %125 = sbr.rel (%p574_p2) target bundleno = 559 (0x22f), region = 28 }
  0x14   : > { %494 = dma.vmem_to_smem (!%p492_p5), %s105_s13, 16, %s542_s16, [#allocation4]  }
  0x18   : > { %535 = dma.done.wait (%p495_p3), [#allocation4], 16  }
  0x19   : > { %537 = vsyncadd (%p495_p3), [#allocation4], 4294967280 }
  0x1a   : > { %131 = sfence }
  0x1b   : > { %p148_p0 = scmp.lt.s32.totalorder %s434_s10, 1  ;;  %v543_v0 = vmov 1.0   ;;  %vm260_vm0 = vcmask 0   ;;  %vm262_vm1 = vcmask 41000   ;;  %v544_v33 = vmov 0.0   ;;  %s545_s21 = smov 1  }
  0x1c   : > { %254 = vmatprep.mubr.f32.mxu0 %v543_v0  ;;  %261 = vst.msk [vmem:[#allocation2] sm:$0x1] %vm260_vm0, %v544_v33  ;;  %s446_s22 = sld [smem:[#allocation3 + $0x2]]  ;;  %vm268_vm2 = vcmask 32776   ;;  %s546_s24 = smov 126   ;;  %v297_v52 = vlaneseq  ;;  %vm334_vm3 = vcmask 31744  }
  0x1d   : > { %s824_s10 = smov (!%p148_p0, %s434_s10), 1  ;;  %263 = vst.msk [vmem:[#allocation2] sm:$0x1] %vm262_vm1, %v544_v33  ;;  %s445_s23 = sld [smem:[#allocation3 + $0x1]] }
  0x1e   : > { %s450_s17 = sshll.u32 %s824_s10, 8  ;;  %s547_s25 = smov 127   ;;  %v298_v53 = vshrl.u32 %v297_v52, 7 }
  0x1f   : > { %s594_s20 = scalar_lea.vmem %s820_s1, %s450_s17  ;;  %s270_s26 = sld [smem:[#allocation3]] }
  0x20   : > { %v597_v1 = vld [vmem:[%s594_s20 + $0xf8] sm:$0xff]  ;;  %v603_v3 = vld [vmem:[%s594_s20 + $0xf0] sm:$0xff]  ;;  %v611_v5 = vld [vmem:[%s594_s20 + $0xe8] sm:$0xff]  ;;  %v299_v54 = vsub.s32 0, %v298_v53  ;;  %s721_s29 = scalar_lea.vmem %s821_s2, %s450_s17 }
  0x21   : > { %v600_v2 = vld [vmem:[%s594_s20 + $0x78] sm:$0xff]  ;;  %452 = vmatprep.subr.mxu0 %v597_v1  ;;  %v607_v4 = vld [vmem:[%s594_s20 + $0x70] sm:$0xff]  ;;  %v615_v6 = vld [vmem:[%s594_s20 + $0x68] sm:$0xff] }
  0x22   : > { %453 = vmatpush3.msra.mxu0 %v600_v2  ;;  %v619_v7 = vld [vmem:[%s594_s20 + $0xe0] sm:$0xff]  ;;  %v627_v9 = vld [vmem:[%s594_s20 + $0xd8] sm:$0xff]  ;;  %v635_v11 = vld [vmem:[%s594_s20 + $0xd0] sm:$0xff]  ;;  %v283_v38 = vstv %s446_s22 }
  0x23   : > { %454 = vmatprep.subr.mxu0 %v603_v3  ;;  %v623_v8 = vld [vmem:[%s594_s20 + $0x60] sm:$0xff]  ;;  %v631_v10 = vld [vmem:[%s594_s20 + $0x58] sm:$0xff]  ;;  %v639_v12 = vld [vmem:[%s594_s20 + $0x50] sm:$0xff]  ;;  %v275_v39 = vstv %s445_s23 }
  0x24   : > { %455 = vmatpush3.msra.mxu0 %v607_v4  ;;  %v643_v13 = vld [vmem:[%s594_s20 + $0xc8] sm:$0xff]  ;;  %v651_v15 = vld [vmem:[%s594_s20 + $0xc0] sm:$0xff]  ;;  %v659_v17 = vld [vmem:[%s594_s20 + $0xb8] sm:$0xff] }
  0x25   : > { %456 = vmatprep.subr.mxu0 %v611_v5  ;;  %v647_v14 = vld [vmem:[%s594_s20 + $0x48] sm:$0xff]  ;;  %v655_v16 = vld [vmem:[%s594_s20 + $0x40] sm:$0xff]  ;;  %v663_v18 = vld [vmem:[%s594_s20 + $0x38] sm:$0xff]  ;;  %v272_v43 = vstv %s270_s26 }
  0x26   : > { %457 = vmatpush3.msra.mxu0 %v615_v6  ;;  %v667_v19 = vld [vmem:[%s594_s20 + $0xb0] sm:$0xff]  ;;  %v675_v21 = vld [vmem:[%s594_s20 + $0xa8] sm:$0xff]  ;;  %v683_v23 = vld [vmem:[%s594_s20 + $0xa0] sm:$0xff] }
  0x27   : > { %458 = vmatprep.subr.mxu0 %v619_v7  ;;  %v671_v20 = vld [vmem:[%s594_s20 + $0x30] sm:$0xff]  ;;  %v679_v22 = vld [vmem:[%s594_s20 + $0x28] sm:$0xff]  ;;  %v687_v24 = vld [vmem:[%s594_s20 + $0x20] sm:$0xff] }
  0x28   : > { %459 = vmatpush3.msra.mxu0 %v623_v8  ;;  %v691_v25 = vld [vmem:[%s594_s20 + $0x98] sm:$0xff]  ;;  %v699_v27 = vld [vmem:[%s594_s20 + $0x90] sm:$0xff]  ;;  %v705_v29 = vld [vmem:[%s594_s20 + $0x88] sm:$0xff] }
  0x29   : > { %460 = vmatprep.subr.mxu0 %v627_v9  ;;  %v695_v26 = vld [vmem:[%s594_s20 + $0x18] sm:$0xff]  ;;  %v160_v28 = vld [vmem:[%s594_s20 + $0x10] sm:$0xff]  ;;  %v159_v30 = vld [vmem:[%s594_s20 + $0x8] sm:$0xff] }
  0x2a   : > { %461 = vmatpush3.msra.mxu0 %v631_v10  ;;  %v710_v31 = vld [vmem:[%s594_s20 + $0x80] sm:$0xff] }
  0x2b   : > { %462 = vmatprep.subr.mxu0 %v635_v11  ;;  %v158_v32 = vld [vmem:[%s594_s20] sm:$0xff] }
  0x2c   : > { %463 = vmatpush3.msra.mxu0 %v639_v12 }
  0x2d   : > { %464 = vmatprep.subr.mxu0 %v643_v13 }
  0x2e   : > { %465 = vmatpush3.msra.mxu0 %v647_v14 }
  0x2f   : > { %466 = vmatprep.subr.mxu0 %v651_v15 }
  0x30   : > { %467 = vmatpush3.msra.mxu0 %v655_v16 }
  0x31   : > { %468 = vmatprep.subr.mxu0 %v659_v17 }
  0x32   : > { %469 = vmatpush3.msra.mxu0 %v663_v18 }
  0x33   : > { %470 = vmatprep.subr.mxu0 %v667_v19 }
  0x34   : > { %471 = vmatpush3.msra.mxu0 %v671_v20 }
  0x35   : > { %472 = vmatprep.subr.mxu0 %v675_v21 }
  0x36   : > { %473 = vmatpush3.msra.mxu0 %v679_v22 }
  0x37   : > { %474 = vmatprep.subr.mxu0 %v683_v23 }
  0x38   : > { %475 = vmatpush3.msra.mxu0 %v687_v24 }
  0x39   : > { %476 = vmatprep.subr.mxu0 %v691_v25 }
  0x3a   : > { %477 = vmatpush3.msra.mxu0 %v695_v26 }
  0x3b   : > { %478 = vmatprep.subr.mxu0 %v699_v27 }
  0x3c   : > { %479 = vmatpush3.msra.mxu0 %v160_v28 }
  0x3d   : > { %480 = vmatprep.subr.mxu0 %v705_v29 }
  0x3e   : > { %481 = vmatpush3.msra.mxu0 %v159_v30 }
  0x3f   : > { %482 = vmatprep.subr.mxu0 %v710_v31 }
  0x40   : > { %483 = vmatpush3.msra.mxu0 %v158_v32 }
  0x41   : > { %255 = vmatmul.mubr.f32.vlgmr.msra.gmra.mxu0 %v543_v0 }
 0x101   : > { %v484_v34 = vpop.f32.mrf.mxu0 }
 0x103   : > { %v485_v35 = vpop.f32.mrf.mxu0 }
 0x104   : > { %v486_v36 = vadd.f32 %v485_v35, %v484_v34 }
 0x106   : > { %265 = vrot.lane.b32.xlu0 %v486_v36, %s545_s21 }
 0x178   : > { %v266_v37 = vpop.permute.xlu0 %265 }
 0x179   : > { %269 = vst.msk [vmem:[#allocation2] sm:$0x1] %vm268_vm2, %v266_v37 }
 0x180   : > { %v271_v40 = vld [vmem:[#allocation2] sm:$0x1] }
 0x181   : > { %v284_v41 = vmul.f32 %v283_v38, %v271_v40  ;;  %v276_v42 = vmul.f32 %v275_v39, %v271_v40  ;;  %v273_v44 = vmul.f32 %v272_v43, %v271_v40 }
 0x183   : > { %286 = vrot.lane.b32.xlu1 %v284_v41, %s546_s24  ;;  %278 = vrot.lane.b32.xlu0 %v276_v42, %s547_s25 }
 0x1f5   : > { %v279_v45 = vpop.permute.xlu0 %278  ;;  %v287_v47 = vpop.permute.xlu1 %286 }
 0x1f6   : > { %v281_v46 = vadd.f32 %v279_v45, %v273_v44 }
 0x1f8   : > { %v289_v48 = vadd.f32 %v287_v47, %v281_v46 }
 0x1fa   : > { %v447_v49 = vmul.f32 -1.442695, %v289_v48 }
 0x1fc   : > { %511 = vpow2.f32 %v447_v49 }
 0x209   : > { %v512_v50 = vpop.eup %511 }
 0x20a   : > { %v293_v51 = vadd.f32 1.0, %v512_v50 }
 0x20c   : > { %513 = vrcp.f32 %v293_v51 }
 0x219   : > { %v514_v55 = vpop.eup %513 }
 0x21a   : > { %v300_v56 = vrot.slane %v514_v55, %v299_v54 }
 0x21c   : > { %v302_v57 = vmul.f32 %v300_v56, %v158_v32  ;;  %v303_v58 = vmul.f32 %v300_v56, %v159_v30  ;;  %v304_v59 = vmul.f32 %v300_v56, %v160_v28  ;;  %v305_v60 = vmul.f32 %v300_v56, %v695_v26 }
 0x21d   : > { %v306_v61 = vmul.f32 %v300_v56, %v687_v24  ;;  %v307_v62 = vmul.f32 %v300_v56, %v679_v22  ;;  %v308_v63 = vmul.f32 %v300_v56, %v671_v20  ;;  %v309_v0 = vmul.f32 %v300_v56, %v663_v18 }
 0x21e   : > { %v310_v33 = vmul.f32 %v300_v56, %v655_v16  ;;  %v311_v32 = vmul.f32 %v300_v56, %v647_v14  ;;  %v312_v28 = vmul.f32 %v300_v56, %v639_v12  ;;  %v313_v26 = vmul.f32 %v300_v56, %v631_v10  ;;  %335 = vst.msk [vmem:[%s721_s29] sm:$0xff] %vm334_vm3, %v302_v57 }
 0x21f   : > { %336 = vst.msk [vmem:[%s721_s29 + $0x8] sm:$0xff] %vm334_vm3, %v303_v58  ;;  %337 = vst.msk [vmem:[%s721_s29 + $0x10] sm:$0xff] %vm334_vm3, %v304_v59  ;;  %v314_v16 = vmul.f32 %v300_v56, %v623_v8  ;;  %v315_v14 = vmul.f32 %v300_v56, %v615_v6  ;;  %v316_v12 = vmul.f32 %v300_v56, %v607_v4 }
 0x220   : > { %338 = vst.msk [vmem:[%s721_s29 + $0x18] sm:$0xff] %vm334_vm3, %v305_v60  ;;  %v317_v10 = vmul.f32 %v300_v56, %v600_v2  ;;  %339 = vst.msk [vmem:[%s721_s29 + $0x20] sm:$0xff] %vm334_vm3, %v306_v61  ;;  %v318_v8 = vmul.f32 %v300_v56, %v710_v31  ;;  %v319_v6 = vmul.f32 %v300_v56, %v705_v29 }
 0x221   : > { %340 = vst.msk [vmem:[%s721_s29 + $0x28] sm:$0xff] %vm334_vm3, %v307_v62  ;;  %341 = vst.msk [vmem:[%s721_s29 + $0x30] sm:$0xff] %vm334_vm3, %v308_v63  ;;  %v320_v4 = vmul.f32 %v300_v56, %v699_v27  ;;  %v321_v2 = vmul.f32 %v300_v56, %v691_v25  ;;  %v322_v18 = vmul.f32 %v300_v56, %v683_v23 }
 0x222   : > { %342 = vst.msk [vmem:[%s721_s29 + $0x38] sm:$0xff] %vm334_vm3, %v309_v0  ;;  %343 = vst.msk [vmem:[%s721_s29 + $0x40] sm:$0xff] %vm334_vm3, %v310_v33  ;;  %v323_v20 = vmul.f32 %v300_v56, %v675_v21  ;;  %v324_v22 = vmul.f32 %v300_v56, %v667_v19  ;;  %v325_v24 = vmul.f32 %v300_v56, %v659_v17 }
 0x223   : > { %344 = vst.msk [vmem:[%s721_s29 + $0x48] sm:$0xff] %vm334_vm3, %v311_v32  ;;  %345 = vst.msk [vmem:[%s721_s29 + $0x50] sm:$0xff] %vm334_vm3, %v312_v28  ;;  %v326_v23 = vmul.f32 %v300_v56, %v651_v15  ;;  %v327_v21 = vmul.f32 %v300_v56, %v643_v13  ;;  %v328_v17 = vmul.f32 %v300_v56, %v635_v11 }
 0x224   : > { %346 = vst.msk [vmem:[%s721_s29 + $0x58] sm:$0xff] %vm334_vm3, %v313_v26  ;;  %347 = vst.msk [vmem:[%s721_s29 + $0x60] sm:$0xff] %vm334_vm3, %v314_v16  ;;  %v329_v19 = vmul.f32 %v300_v56, %v627_v9  ;;  %v330_v13 = vmul.f32 %v300_v56, %v619_v7  ;;  %v331_v11 = vmul.f32 %v300_v56, %v611_v5 }
 0x225   : > { %348 = vst.msk [vmem:[%s721_s29 + $0x68] sm:$0xff] %vm334_vm3, %v315_v14  ;;  %349 = vst.msk [vmem:[%s721_s29 + $0x70] sm:$0xff] %vm334_vm3, %v316_v12  ;;  %v332_v15 = vmul.f32 %v300_v56, %v603_v3  ;;  %v333_v9 = vmul.f32 %v300_v56, %v597_v1 }
 0x226   : > { %350 = vst.msk [vmem:[%s721_s29 + $0x78] sm:$0xff] %vm334_vm3, %v317_v10  ;;  %351 = vst.msk [vmem:[%s721_s29 + $0x80] sm:$0xff] %vm334_vm3, %v318_v8 }
 0x227   : > { %352 = vst.msk [vmem:[%s721_s29 + $0x88] sm:$0xff] %vm334_vm3, %v319_v6  ;;  %353 = vst.msk [vmem:[%s721_s29 + $0x90] sm:$0xff] %vm334_vm3, %v320_v4 }
 0x228   : > { %354 = vst.msk [vmem:[%s721_s29 + $0x98] sm:$0xff] %vm334_vm3, %v321_v2  ;;  %355 = vst.msk [vmem:[%s721_s29 + $0xa0] sm:$0xff] %vm334_vm3, %v322_v18 }
 0x229   : > { %356 = vst.msk [vmem:[%s721_s29 + $0xa8] sm:$0xff] %vm334_vm3, %v323_v20  ;;  %357 = vst.msk [vmem:[%s721_s29 + $0xb0] sm:$0xff] %vm334_vm3, %v324_v22 }
 0x22a   : > { %358 = vst.msk [vmem:[%s721_s29 + $0xb8] sm:$0xff] %vm334_vm3, %v325_v24  ;;  %359 = vst.msk [vmem:[%s721_s29 + $0xc0] sm:$0xff] %vm334_vm3, %v326_v23 }
 0x22b   : > { %360 = vst.msk [vmem:[%s721_s29 + $0xc8] sm:$0xff] %vm334_vm3, %v327_v21  ;;  %361 = vst.msk [vmem:[%s721_s29 + $0xd0] sm:$0xff] %vm334_vm3, %v328_v17 }
 0x22c   : > { %362 = vst.msk [vmem:[%s721_s29 + $0xd8] sm:$0xff] %vm334_vm3, %v329_v19  ;;  %363 = vst.msk [vmem:[%s721_s29 + $0xe0] sm:$0xff] %vm334_vm3, %v330_v13 }
 0x22d   : > { %364 = vst.msk [vmem:[%s721_s29 + $0xe8] sm:$0xff] %vm334_vm3, %v331_v11  ;;  %365 = vst.msk [vmem:[%s721_s29 + $0xf0] sm:$0xff] %vm334_vm3, %v332_v15 }
 0x22e   : > { %366 = vst.msk [vmem:[%s721_s29 + $0xf8] sm:$0xff] %vm334_vm3, %v333_v9 }
 0x22f PF: > { %s13_s9 = sadd.s32 1, %s540_s9  }
 0x230   : > { %p10_p1 = scmp.ge.s32.totalorder %s13_s9, 4  }
 0x232   :  { %12 = sbr.rel (!%p10_p1) target bundleno = 1 (0x1), region = 63 }
 0x237   :  { %388 = vsyncpa [#allocation4], 1 }
 0x238   :  { %390 = vsyncpa [#allocation4 + $0x1], 1 }

</bundles_post_ra>
